<compile_context>
chip_gen: v7x
topology: tpu7x:2x2x1
jax: 0.10.0
libtpu: 0.0.40
codegen_flags: <defaults>
</compile_context>

<pallas_src>
import functools

import jax
import jax.numpy as jnp
from jax.experimental import pallas as pl
from jax.experimental.pallas import tpu as pltpu


def _round_up(n, m):
    return ((n + m - 1) // m) * m


def _sigmoid(v):
    # sigmoid(v) == 0.5 * (tanh(v/2) + 1): single EUP transcendental, no divide.
    return 0.5 * (jnp.tanh(0.5 * v) + 1.0)


def gclstm_mlp_kernel(x_ref, wg_ref, bg_ref, w1_ref, b1_ref, w2_ref, b2_ref,
                      w3_ref, b3_ref, out_ref, *, hidden_size, gate_stride,
                      has_forget):
    """Fused GCLSTM(K=1, H0=C0=0) cell + ReLU + 3-layer MLP on one node block.

    x_ref  : (BN, D)       node-feature block (f32 or bf16)
    wg_ref : (D, G*Hp)     packed gate weights, G in {3,4}, Hp = lane-padded H
    bg_ref : (1, G*Hp)     per-gate bias (ChebConv bias + gate bias), f32
    w1_ref : (H, H2)  b1_ref: (1, H2)    MLP layer 1 (weight^T)
    w2_ref : (H2, H4) b2_ref: (1, H4)    MLP layer 2 (weight^T)
    w3_ref : (1, H4)  b3_ref: (1, 1)     MLP layer 3 (row layout), f32
    out_ref: (1, BN)       lane-dense per-block output row
    """
    H, Hp = hidden_size, gate_stride
    x = x_ref[...]

    # One fused MXU matmul for all live gates; f32 accumulation.
    gates = (jnp.dot(x, wg_ref[...], preferred_element_type=jnp.float32)
             + bg_ref[...])                                     # (BN, G*Hp)

    c_blk = 2 if has_forget else 1     # forget-gate slice (if packed) is dead:
    o_blk = c_blk + 1                  # it only multiplies C0 == 0.
    i_g = _sigmoid(gates[:, 0:H])
    g_g = jnp.tanh(gates[:, c_blk * Hp:c_blk * Hp + H])
    o_g = _sigmoid(gates[:, o_blk * Hp:o_blk * Hp + H])

    c = i_g * g_g                      # C = F*C0 + I*G, with C0 == 0
    h = o_g * jnp.tanh(c)              # GCLSTM hidden state

    a = jnp.maximum(h, 0.0)            # F.relu (f32)
    z1 = jnp.maximum(
        jnp.dot(a.astype(w1_ref.dtype), w1_ref[...],
                preferred_element_type=jnp.float32) + b1_ref[...], 0.0)
    z2 = jnp.maximum(
        jnp.dot(z1.astype(w2_ref.dtype), w2_ref[...],
                preferred_element_type=jnp.float32) + b2_ref[...], 0.0)

    # output_size == 1: last layer as f32 VPU multiply + lane reduction instead
    # of an N=1 MXU matmul; store lane-dense as a (1, BN) row (unmasked vst).
    y = jnp.sum(z2 * w3_ref[...], axis=-1)                      # (BN,)
    out_ref[...] = y.reshape(1, -1) + b3_ref[...]


def _choose_tiling(n):
    """Pick (n_pad, block) so blocks are sublane/lane friendly and, when N is
    large enough, there are >= 2 blocks for v7x's two TensorCores."""
    BN_MAX = 512
    n8 = _round_up(max(n, 8), 8)
    if n8 <= 256:
        return n8, n8                       # single block: grid overhead wins
    bn = min(BN_MAX, _round_up(-(-n8 // 2), 128))   # >=2 blocks, lane-aligned
    return _round_up(n8, bn), bn


def _forward_impl(x, params, *, hidden_size, gate_stride, has_forget, use_bf16):
    x = x.astype(jnp.float32)
    N, D = x.shape
    wg, bg, w1, b1, w2, b2, w3, b3 = params

    if use_bf16:
        # bf16 only on MXU operands (x + matmul weights); biases and the final
        # elementwise w3/b3 stay f32 so all VPU/EUP math stays f32 (v5e-safe).
        x = x.astype(jnp.bfloat16)
        wg = wg.astype(jnp.bfloat16)
        w1 = w1.astype(jnp.bfloat16)
        w2 = w2.astype(jnp.bfloat16)

    n_pad, BN = _choose_tiling(N)
    if n_pad != N:
        x = jnp.pad(x, ((0, n_pad - N), (0, 0)))
    n_blocks = n_pad // BN

    def resident(arr):   # whole (small) array, VMEM-resident across all blocks
        return pl.BlockSpec(arr.shape, lambda i: (0, 0))

    H, H2, H4 = hidden_size, w1.shape[1], w2.shape[1]
    gcols = wg.shape[1]
    weight_bytes = sum(int(a.size) * a.dtype.itemsize
                       for a in (wg, bg, w1, b1, w2, b2, w3, b3))
    cost = pl.CostEstimate(
        flops=2 * n_pad * (D * gcols + H * H2 + H2 * H4 + H4),
        transcendentals=4 * n_pad * H,
        bytes_accessed=n_pad * D * x.dtype.itemsize + weight_bytes + n_pad * 4)

    kernel = functools.partial(gclstm_mlp_kernel,
                               hidden_size=hidden_size,
                               gate_stride=gate_stride,
                               has_forget=has_forget)

    out = pl.pallas_call(
        kernel,
        out_shape=jax.ShapeDtypeStruct((1, n_pad), jnp.float32),
        grid=(n_blocks,),
        in_specs=[pl.BlockSpec((BN, D), lambda i: (i, 0)),
                  resident(wg), resident(bg),
                  resident(w1), resident(b1),
                  resident(w2), resident(b2),
                  resident(w3), resident(b3)],
        out_specs=pl.BlockSpec((1, BN), lambda i: (0, i)),   # lane-dense output
        compiler_params=pltpu.CompilerParams(
            dimension_semantics=("parallel",)),
        cost_estimate=cost,
    )(x, wg, bg, w1, b1, w2, b2, w3, b3)

    return out[0, :N]                                        # squeeze(-1)


_forward_jit = jax.jit(
    _forward_impl,
    static_argnames=("hidden_size", "gate_stride", "has_forget", "use_bf16"))


def gcn_lstm_forward(x, edge_index, edge_weight, params, meta, use_bf16=False):
    """x: (N, D) node features.  Returns (N,), like the PyTorch module.

    edge_index / edge_weight are accepted for API parity but are mathematically
    unused: GCLSTM(K=1)'s ChebConv reduces to T_0(L)=I (no neighbour mixing).
    """
    del edge_index, edge_weight
    return _forward_jit(x, params,
                        hidden_size=meta["hidden_size"],
                        gate_stride=meta["gate_stride"],
                        has_forget=meta["has_forget"],
                        use_bf16=use_bf16)


def init_params(key, input_size, hidden_size, output_size=1):
    """Random parameters mirroring GCLSTM(K=1) + the MLP head (PyTorch layout)."""
    D, H = input_size, hidden_size
    assert H % 4 == 0, "MLP head needs hidden_size divisible by 4"
    H2, H4 = H // 2, H // 4
    ks = jax.random.split(key, 22)

    def u(k, shape, bound):
        return jax.random.uniform(k, shape, jnp.float32, -bound, bound)

    g = 1.0 / jnp.sqrt(jnp.float32(H))
    names = ("i", "f", "c", "o")
    W = {n: u(ks[j], (D, H), g) for j, n in enumerate(names)}           # X-path
    Theta = {n: u(ks[4 + j], (H, H), g) for j, n in enumerate(names)}   # ChebConv lin (acts on H)
    b_conv = {n: u(ks[8 + j], (H,), g) for j, n in enumerate(names)}    # ChebConv bias
    b_gate = {n: u(ks[12 + j], (H,), g) for j, n in enumerate(names)}   # gate bias

    k1 = 1.0 / jnp.sqrt(jnp.float32(H))
    W1 = u(ks[16], (H2, H), k1); b1 = u(ks[17], (H2,), k1)
    k2 = 1.0 / jnp.sqrt(jnp.float32(H2))
    W2 = u(ks[18], (H4, H2), k2); b2 = u(ks[19], (H4,), k2)
    k3 = 1.0 / jnp.sqrt(jnp.float32(H4))
    W3 = u(ks[20], (output_size, H4), k3); b3 = u(ks[21], (output_size,), k3)

    return dict(W=W, Theta=Theta, b_conv=b_conv, b_gate=b_gate,
                W1=W1, b1=b1, W2=W2, b2=b2, W3=W3, b3=b3)


def pack_params(raw):
    """Pack raw (PyTorch-layout) params into the kernel layout.

    * ChebConv weights on H (Theta) are dropped: the module always calls the
      cell with H=None -> H0 == 0, so H0 @ Theta^T == 0 exactly; only the
      ChebConv bias survives and is folded into the gate bias.
    * The dead forget gate is dropped from the packed weights whenever 4H > 128
      (it only multiplies C0 == 0); the 4-gate packing is kept when 4H <= 128
      so all gates share one vreg.
    * When H >= 128 each gate's column block is padded to a multiple of 128
      lanes so gate slices fall on vreg boundaries.
    """
    D, H = raw["W"]["i"].shape
    out_size = raw["W3"].shape[0]
    assert out_size == 1, "kernel's final layer assumes output_size == 1"
    assert H % 4 == 0, "MLP head needs hidden_size divisible by 4"

    if 4 * H <= 128:
        gate_names = ("i", "f", "c", "o")      # one vreg; keep packed
    else:
        gate_names = ("i", "c", "o")           # drop dead forget gate
    Hpad = _round_up(H, 128) if H >= 128 else H
    # TODO(synk): for 32 < H < 128 gate slices are still sub-vreg (masked
    # extracts); padding to 128 would triple MXU columns, so it is skipped.

    def pad_w(w):    # (D, H) -> (D, Hpad)
        return jnp.pad(w, ((0, 0), (0, Hpad - H))) if Hpad != H else w

    def pad_b(b):    # (H,) -> (Hpad,)
        return jnp.pad(b, (0, Hpad - H)) if Hpad != H else b

    wg = jnp.concatenate([pad_w(raw["W"][n]) for n in gate_names], axis=1)
    bg = jnp.concatenate([pad_b(raw["b_conv"][n] + raw["b_gate"][n])
                          for n in gate_names])

    params = (wg, bg.reshape(1, -1),
              raw["W1"].T, raw["b1"].reshape(1, -1),
              raw["W2"].T, raw["b2"].reshape(1, -1),
              raw["W3"],   raw["b3"].reshape(1, -1))
    meta = dict(hidden_size=H, gate_stride=Hpad,
                has_forget=(len(gate_names) == 4))
    return params, meta


def reference_forward(x, edge_index, edge_weight, raw):
    """Pure-JAX literal transcription of GCN_LSTM.forward (GCLSTM with K=1)."""
    del edge_index, edge_weight    # K=1 ChebConv: only T_0(L)=I, no neighbour mixing
    X = x.astype(jnp.float32)
    N = X.shape[0]
    H = raw["W"]["i"].shape[1]
    H0 = jnp.zeros((N, H), jnp.float32)     # _set_hidden_state(X, None)
    C0 = jnp.zeros((N, H), jnp.float32)     # _set_cell_state(X, None)

    def pre(n):
        conv = H0 @ raw["Theta"][n].T + raw["b_conv"][n]   # ChebConv(K=1)(H0)
        return X @ raw["W"][n] + conv + raw["b_gate"][n]

    I = jax.nn.sigmoid(pre("i"))
    F = jax.nn.sigmoid(pre("f"))
    G = jnp.tanh(pre("c"))
    C = F * C0 + I * G
    O = jax.nn.sigmoid(pre("o"))
    Hh = O * jnp.tanh(C)

    a = jnp.maximum(Hh, 0.0)
    z1 = jnp.maximum(a @ raw["W1"].T + raw["b1"], 0.0)
    z2 = jnp.maximum(z1 @ raw["W2"].T + raw["b2"], 0.0)
    y = z2 @ raw["W3"].T + raw["b3"]
    return jnp.squeeze(y, -1)   # source's `sequeeze` typo -> intended squeeze(-1)


if __name__ == "__main__":
    def run_case(key, N, D, H, use_bf16, tol):
        kx, kp, ke, kw = jax.random.split(key, 4)
        E = 4 * N
        x = jax.random.normal(kx, (N, D), dtype=jnp.float32)
        edge_index = jax.random.randint(ke, (2, E), 0, N, dtype=jnp.int32)
        edge_weight = jax.random.uniform(kw, (E,), dtype=jnp.float32)

        raw = init_params(kp, input_size=D, hidden_size=H, output_size=1)
        params, meta = pack_params(raw)

        out = gcn_lstm_forward(x, edge_index, edge_weight, params, meta,
                               use_bf16=use_bf16)
        out = jax.block_until_ready(out)
        assert out.shape == (N,), out.shape

        ref = reference_forward(x, edge_index, edge_weight, raw)
        err = float(jnp.max(jnp.abs(out - ref)))
        assert err <= tol, (N, D, H, use_bf16, err)

    key = jax.random.PRNGKey(0)
    k1, k2, k3 = jax.random.split(key, 3)
    # Small shapes (module's natural sizes): single-block, 4-gate vreg packing.
    run_case(k1, N=16, D=8, H=32, use_bf16=False, tol=1e-3)
    # Multi-block path (>=2 blocks for v7x), 3-gate packing with H=128.
    run_case(k2, N=700, D=16, H=128, use_bf16=False, tol=1e-3)
    # bf16 MXU path (v6e/v7x HBM-roofline lever); f32 elementwise math.
    run_case(k3, N=700, D=16, H=128, use_bf16=True, tol=1.5e-1)

    print("KERNEL_OK")
</pallas_src>

<mosaic_0001>
module attributes {stable_mosaic.version = 11 : i64} {
  func.func @gclstm_mlp_kernel(%arg0: i32, %arg1: memref<16x8xf32, #tpu.memory_space<vmem>>, %arg2: memref<8x128xf32, #tpu.memory_space<vmem>>, %arg3: memref<1x128xf32, #tpu.memory_space<vmem>>, %arg4: memref<32x16xf32, #tpu.memory_space<vmem>>, %arg5: memref<1x16xf32, #tpu.memory_space<vmem>>, %arg6: memref<16x8xf32, #tpu.memory_space<vmem>>, %arg7: memref<1x8xf32, #tpu.memory_space<vmem>>, %arg8: memref<1x8xf32, #tpu.memory_space<vmem>>, %arg9: memref<1x1xf32, #tpu.memory_space<vmem>>, %arg10: memref<1x16xf32, #tpu.memory_space<vmem>>) attributes {dimension_semantics = [#tpu.dimension_semantics<parallel>], iteration_bounds = array<i64: 1>, scalar_prefetch = 0 : i64, scratch_operands = 0 : i64, tpu.core_type = #tpu.core_type<tc>, window_params = [{transform_indices = @transform_0, window_bounds = array<i64: 16, 8>}, {pipeline_mode = #tpu.pipeline_mode<synchronous>, transform_indices = @transform_1, window_bounds = array<i64: 8, 128>}, {pipeline_mode = #tpu.pipeline_mode<synchronous>, transform_indices = @transform_2, window_bounds = array<i64: 1, 128>}, {pipeline_mode = #tpu.pipeline_mode<synchronous>, transform_indices = @transform_3, window_bounds = array<i64: 32, 16>}, {pipeline_mode = #tpu.pipeline_mode<synchronous>, transform_indices = @transform_4, window_bounds = array<i64: 1, 16>}, {pipeline_mode = #tpu.pipeline_mode<synchronous>, transform_indices = @transform_5, window_bounds = array<i64: 16, 8>}, {pipeline_mode = #tpu.pipeline_mode<synchronous>, transform_indices = @transform_6, window_bounds = array<i64: 1, 8>}, {pipeline_mode = #tpu.pipeline_mode<synchronous>, transform_indices = @transform_7, window_bounds = array<i64: 1, 8>}, {pipeline_mode = #tpu.pipeline_mode<synchronous>, transform_indices = @transform_8, window_bounds = array<i64: 1, 1>}, {transform_indices = @transform_9, window_bounds = array<i64: 1, 16>}]} {
    %c0 = arith.constant 0 : index
    %c0_0 = arith.constant 0 : index
    %0 = vector.load %arg1[%c0, %c0_0] : memref<16x8xf32, #tpu.memory_space<vmem>>, vector<16x8xf32>
    %c0_1 = arith.constant 0 : index
    %c0_2 = arith.constant 0 : index
    %1 = vector.load %arg2[%c0_1, %c0_2] : memref<8x128xf32, #tpu.memory_space<vmem>>, vector<8x128xf32>
    %cst = arith.constant dense<0.000000e+00> : vector<16x128xf32>
    %2 = tpu.matmul %0, %1, %cst {dimension_numbers = #tpu.dot_dimension_numbers<[1], [0], [0], [1], [0, 0, 1, 1], [], []>} : vector<16x8xf32>, vector<8x128xf32>, vector<16x128xf32> -> vector<16x128xf32>
    %c0_3 = arith.constant 0 : index
    %c0_4 = arith.constant 0 : index
    %3 = vector.load %arg3[%c0_3, %c0_4] : memref<1x128xf32, #tpu.memory_space<vmem>>, vector<1x128xf32>
    %4 = vector.broadcast %3 : vector<1x128xf32> to vector<16x128xf32>
    %5 = arith.addf %2, %4 : vector<16x128xf32>
    %6 = vector.extract_strided_slice %5 {offsets = [0, 0], sizes = [16, 32], strides = [1, 1]} : vector<16x128xf32> to vector<16x32xf32>
    %cst_5 = arith.constant 5.000000e-01 : f32
    %7 = vector.broadcast %cst_5 : f32 to vector<16x32xf32>
    %8 = arith.mulf %7, %6 : vector<16x32xf32>
    %9 = math.tanh %8 : vector<16x32xf32>
    %cst_6 = arith.constant 1.000000e+00 : f32
    %10 = vector.broadcast %cst_6 : f32 to vector<16x32xf32>
    %11 = arith.addf %9, %10 : vector<16x32xf32>
    %cst_7 = arith.constant 5.000000e-01 : f32
    %12 = vector.broadcast %cst_7 : f32 to vector<16x32xf32>
    %13 = arith.mulf %12, %11 : vector<16x32xf32>
    %14 = vector.extract_strided_slice %5 {offsets = [0, 64], sizes = [16, 32], strides = [1, 1]} : vector<16x128xf32> to vector<16x32xf32>
    %15 = math.tanh %14 : vector<16x32xf32>
    %16 = vector.extract_strided_slice %5 {offsets = [0, 96], sizes = [16, 32], strides = [1, 1]} : vector<16x128xf32> to vector<16x32xf32>
    %cst_8 = arith.constant 5.000000e-01 : f32
    %17 = vector.broadcast %cst_8 : f32 to vector<16x32xf32>
    %18 = arith.mulf %17, %16 : vector<16x32xf32>
    %19 = math.tanh %18 : vector<16x32xf32>
    %cst_9 = arith.constant 1.000000e+00 : f32
    %20 = vector.broadcast %cst_9 : f32 to vector<16x32xf32>
    %21 = arith.addf %19, %20 : vector<16x32xf32>
    %cst_10 = arith.constant 5.000000e-01 : f32
    %22 = vector.broadcast %cst_10 : f32 to vector<16x32xf32>
    %23 = arith.mulf %22, %21 : vector<16x32xf32>
    %24 = arith.mulf %13, %15 : vector<16x32xf32>
    %25 = math.tanh %24 : vector<16x32xf32>
    %26 = arith.mulf %23, %25 : vector<16x32xf32>
    %cst_11 = arith.constant 0.000000e+00 : f32
    %27 = vector.broadcast %cst_11 : f32 to vector<16x32xf32>
    %28 = arith.maximumf %26, %27 : vector<16x32xf32>
    %c0_12 = arith.constant 0 : index
    %c0_13 = arith.constant 0 : index
    %29 = vector.load %arg4[%c0_12, %c0_13] : memref<32x16xf32, #tpu.memory_space<vmem>>, vector<32x16xf32>
    %cst_14 = arith.constant dense<0.000000e+00> : vector<16x16xf32>
    %30 = tpu.matmul %28, %29, %cst_14 {dimension_numbers = #tpu.dot_dimension_numbers<[1], [0], [0], [1], [0, 0, 1, 1], [], []>} : vector<16x32xf32>, vector<32x16xf32>, vector<16x16xf32> -> vector<16x16xf32>
    %c0_15 = arith.constant 0 : index
    %c0_16 = arith.constant 0 : index
    %31 = vector.load %arg5[%c0_15, %c0_16] : memref<1x16xf32, #tpu.memory_space<vmem>>, vector<1x16xf32>
    %32 = vector.broadcast %31 : vector<1x16xf32> to vector<16x16xf32>
    %33 = arith.addf %30, %32 : vector<16x16xf32>
    %cst_17 = arith.constant 0.000000e+00 : f32
    %34 = vector.broadcast %cst_17 : f32 to vector<16x16xf32>
    %35 = arith.maximumf %33, %34 : vector<16x16xf32>
    %c0_18 = arith.constant 0 : index
    %c0_19 = arith.constant 0 : index
    %36 = vector.load %arg6[%c0_18, %c0_19] : memref<16x8xf32, #tpu.memory_space<vmem>>, vector<16x8xf32>
    %cst_20 = arith.constant dense<0.000000e+00> : vector<16x8xf32>
    %37 = tpu.matmul %35, %36, %cst_20 {dimension_numbers = #tpu.dot_dimension_numbers<[1], [0], [0], [1], [0, 0, 1, 1], [], []>} : vector<16x16xf32>, vector<16x8xf32>, vector<16x8xf32> -> vector<16x8xf32>
    %c0_21 = arith.constant 0 : index
    %c0_22 = arith.constant 0 : index
    %38 = vector.load %arg7[%c0_21, %c0_22] : memref<1x8xf32, #tpu.memory_space<vmem>>, vector<1x8xf32>
    %39 = vector.broadcast %38 : vector<1x8xf32> to vector<16x8xf32>
    %40 = arith.addf %37, %39 : vector<16x8xf32>
    %cst_23 = arith.constant 0.000000e+00 : f32
    %41 = vector.broadcast %cst_23 : f32 to vector<16x8xf32>
    %42 = arith.maximumf %40, %41 : vector<16x8xf32>
    %c0_24 = arith.constant 0 : index
    %c0_25 = arith.constant 0 : index
    %43 = vector.load %arg8[%c0_24, %c0_25] : memref<1x8xf32, #tpu.memory_space<vmem>>, vector<1x8xf32>
    %44 = vector.broadcast %43 : vector<1x8xf32> to vector<16x8xf32>
    %45 = arith.mulf %42, %44 : vector<16x8xf32>
    %cst_26 = arith.constant dense<0.000000e+00> : vector<16xf32>
    %46 = vector.multi_reduction <add>, %45, %cst_26 [1] : vector<16x8xf32> to vector<16xf32>
    %47 = vector.shape_cast %46 : vector<16xf32> to vector<1x16xf32>
    %c0_27 = arith.constant 0 : index
    %c0_28 = arith.constant 0 : index
    %48 = vector.load %arg9[%c0_27, %c0_28] : memref<1x1xf32, #tpu.memory_space<vmem>>, vector<1x1xf32>
    %49 = vector.broadcast %48 : vector<1x1xf32> to vector<1x16xf32>
    %50 = arith.addf %47, %49 : vector<1x16xf32>
    %c0_29 = arith.constant 0 : index
    %c0_30 = arith.constant 0 : index
    %51 = vector.load %arg10[%c0_29, %c0_30] : memref<1x16xf32, #tpu.memory_space<vmem>>, vector<1x16xf32>
    tpu.vector_store %arg10[%c0_29, %c0_30], %50 {strides = array<i32>} : memref<1x16xf32, #tpu.memory_space<vmem>>, vector<1x16xf32>,
    return
  }
  func.func @transform_0(%arg0: i32) -> (i32, i32) {
    %c0_i32 = arith.constant 0 : i32
    %c0_i32_0 = arith.constant 0 : i32
    return %arg0, %c0_i32 : i32, i32
  }
  func.func @transform_1(%arg0: i32) -> (i32, i32) {
    %c0_i32 = arith.constant 0 : i32
    %c0_i32_0 = arith.constant 0 : i32
    %c0_i32_1 = arith.constant 0 : i32
    return %c0_i32, %c0_i32_0 : i32, i32
  }
  func.func @transform_2(%arg0: i32) -> (i32, i32) {
    %c0_i32 = arith.constant 0 : i32
    %c0_i32_0 = arith.constant 0 : i32
    %c0_i32_1 = arith.constant 0 : i32
    return %c0_i32, %c0_i32_0 : i32, i32
  }
  func.func @transform_3(%arg0: i32) -> (i32, i32) {
    %c0_i32 = arith.constant 0 : i32
    %c0_i32_0 = arith.constant 0 : i32
    %c0_i32_1 = arith.constant 0 : i32
    return %c0_i32, %c0_i32_0 : i32, i32
  }
  func.func @transform_4(%arg0: i32) -> (i32, i32) {
    %c0_i32 = arith.constant 0 : i32
    %c0_i32_0 = arith.constant 0 : i32
    %c0_i32_1 = arith.constant 0 : i32
    return %c0_i32, %c0_i32_0 : i32, i32
  }
  func.func @transform_5(%arg0: i32) -> (i32, i32) {
    %c0_i32 = arith.constant 0 : i32
    %c0_i32_0 = arith.constant 0 : i32
    %c0_i32_1 = arith.constant 0 : i32
    return %c0_i32, %c0_i32_0 : i32, i32
  }
  func.func @transform_6(%arg0: i32) -> (i32, i32) {
    %c0_i32 = arith.constant 0 : i32
    %c0_i32_0 = arith.constant 0 : i32
    %c0_i32_1 = arith.constant 0 : i32
    return %c0_i32, %c0_i32_0 : i32, i32
  }
  func.func @transform_7(%arg0: i32) -> (i32, i32) {
    %c0_i32 = arith.constant 0 : i32
    %c0_i32_0 = arith.constant 0 : i32
    %c0_i32_1 = arith.constant 0 : i32
    return %c0_i32, %c0_i32_0 : i32, i32
  }
  func.func @transform_8(%arg0: i32) -> (i32, i32) {
    %c0_i32 = arith.constant 0 : i32
    %c0_i32_0 = arith.constant 0 : i32
    %c0_i32_1 = arith.constant 0 : i32
    return %c0_i32, %c0_i32_0 : i32, i32
  }
  func.func @transform_9(%arg0: i32) -> (i32, i32) {
    %c0_i32 = arith.constant 0 : i32
    %c0_i32_0 = arith.constant 0 : i32
    return %c0_i32, %arg0 : i32, i32
  }
}

</mosaic_0001>

<bundles_post_ra>
// kernel: _forward_impl.1
= control target key start
LH: loop header
LB: loop body
LE: loop exit
PB: predicated region body
PF: predicated region fallthrough
CT: control target
= control target key end

     0   :  { %s625_s0 = inlined_call_operand.vmem [shape: f32[16,8], index: 0, kind: input, shape index: {}]   ;;  %s626_s1 = inlined_call_operand.vmem [shape: f32[8,128], index: 1, kind: input, shape index: {}]   ;;  %s627_s2 = inlined_call_operand.vmem [shape: f32[1,128], index: 2, kind: input, shape index: {}]   ;;  %s628_s3 = inlined_call_operand.vmem [shape: f32[32,16], index: 3, kind: input, shape index: {}]   ;;  %s629_s4 = inlined_call_operand.vmem [shape: f32[1,16], index: 4, kind: input, shape index: {}]   ;;  %s630_s5 = inlined_call_operand.vmem [shape: f32[16,8], index: 5, kind: input, shape index: {}]   ;;  %s631_s6 = inlined_call_operand.vmem [shape: f32[1,8], index: 6, kind: input, shape index: {}]   ;;  %s632_s7 = inlined_call_operand.vmem [shape: f32[1,8], index: 7, kind: input, shape index: {}]   ;;  %s633_s8 = inlined_call_operand.<no memory space> [shape: f32[1,1], index: 8, kind: input, shape index: {}]   ;;  %s634_s9 = inlined_call_operand.hbm [shape: f32[1,16], index: 9, kind: output, shape index: {}]  }
   0x1   :  { %v14_v0 = vstv %s633_s8 }
   0x2   :  { %15 = vst [vmem:[#allocation2] sm:$0x1] %v14_v0 }
   0x3   :  { %v37_v1 = vld [vmem:[%s626_s1] sm:$0xff]  ;;  %vm45_vm0 = vcmask 64512   ;;  %v36_v3 = vld [vmem:[%s625_s0 + $0x8] sm:$0xff] }
   0x4   :  { %v35_v2 = vld [vmem:[%s625_s0] sm:$0xff]  ;;  %435 = vmatprep.subr.mxu0 %v37_v1 }
   0x5   :  { %437 = vmatprep.mubr.msk.f32.mxu0 %vm45_vm0, %v35_v2 }
   0x6   :  { %16 = vsyncpa [#allocation4], 0  ;;  %436 = vmatpush3.msra.mxu0 %v37_v1  ;;  %v412_v4 = vld [vmem:[%s627_s2] ss:$0 sm:$0xff]  ;;  %s512_s1 = smov 64   ;;  %v162_v24 = vld [vmem:[%s628_s3 + $0x8] sm:$0xff]  ;;  %v374_v63 = vlaneseq }
   0x7   :  { %438 = vmatmul.mubr.msk.f32.vlgmr.msra.gmra.mrb[0].mxu0 %vm45_vm0, %v36_v3  ;;  %v161_v23 = vld [vmem:[%s628_s3] sm:$0xff]  ;;  %s513_s20 = smov 96   ;;  %v163_v28 = vld [vmem:[%s628_s3 + $0x10] sm:$0xff]  ;;  %v164_v29 = vld [vmem:[%s628_s3 + $0x18] sm:$0xff]  ;;  %s514_s25 = smov 32   ;;  %vm178_vm1 = vcmask 261120  }
   0x8   :  { %v458_v25 = vpack.c.bf16 %v162_v24, %v161_v23  ;;  %v462_v30 = vpack.c.bf16 %v164_v29, %v163_v28  ;;  %v260_v39 = vld [vmem:[%s630_s5] sm:$0xff]  ;;  %v261_v40 = vld [vmem:[%s630_s5 + $0x8] sm:$0xff]  ;;  %vm269_vm2 = vcmask 130048   ;;  %v515_v49 = vmov 0  }
   0x9   :  { %v466_v41 = vpack.c.bf16 %v261_v40, %v260_v39  ;;  %v415_v42 = vld [vmem:[%s629_s4] ss:$0 sm:$0xff]  ;;  %475 = vset.pattern.permute.xlu0 %v515_v49  ;;  %v375_v0 = vshrl.u32 %v374_v63, 7  ;;  %v383_v1 = vand.u32 127, %v374_v63  ;;  %vm393_vm3 = vcmask 130112  }
   0xa   :  { %459 = vmatprep.subr.bf16.mxu1 %v458_v25  ;;  %v418_v50 = vld [vmem:[%s631_s6] ss:$0 sm:$0xff]  ;;  %s516_s6 = smov [#allocation3]   ;;  %vm396_vm4 = vcmask 122880  }
   0xb   :  { %461 = vmatpush3.bf16.msra.mxu1 %v458_v25  ;;  %467 = vmatprep.subr.bf16.mxu0 %v466_v41  ;;  %v421_v55 = vld [vmem:[%s632_s7] ss:$0 sm:$0xff]  ;;  %v376_v3 = vsub.s32 0, %v375_v0  ;;  %s404_s7 = sshll.u32 %s516_s6, 4  ;;  %s405_s7 = int_to_ptr.vmem [resolvable:$true] %s404_s7 }
   0xc   :  { %463 = vmatprep.subr.bf16.mxu1 %v462_v30  ;;  %469 = vmatpush3.bf16.msra.mxu0 %v466_v41  ;;  %v368_v62 = vld [vmem:[#allocation2] sm:$0x1]  ;;  %s488_s12 = scalar_lea.vmem %s405_s7, 16  ;;  %s492_s13 = scalar_lea.vmem %s405_s7, 32 }
   0xd   :  { %p489_p0 = scmp.ne.s32.totalorder %s405_s7, %s488_s12  ;;  %p493_p1 = scmp.lt.s32.totalorder %s405_s7, %s405_s7 }
   0xe   :  { %p494_p2 = scmp.lt.s32.totalorder %s492_s13, %s488_s12 }
   0xf   :  { %465 = vmatpush3.bf16.msra.mxu1 %v462_v30 }
  0x10   :  { %p495_p3 = por %p494_p2, %p493_p1 }
  0x12   :  { %p496_p4 = pnand %p495_p3, %p489_p0 }
  0xda   :  { %v439_v5 = vpop.f32.mrb[0].mxu0 }
  0xdb   :  { %v118_v6 = vpop.f32.mrb[1].mxu0  ;;  %v124_v8 = vadd.f32 %v439_v5, %v412_v4 }
  0xdc   :  { %v119_v7 = vadd.f32 %v412_v4, %v118_v6  ;;  %v388_v4 = vadd.s32 4294967288, %v383_v1  ;;  %v386_v6 = vsub.s32 %v383_v1, %v375_v0 }
  0xdd   :  { %v128_v12 = vmul.f32 0.5, %v124_v8 }
  0xde   :  { %476 = vtanh.f32 %v119_v7  ;;  %v127_v11 = vmul.f32 0.5, %v119_v7  ;;  %v391_v7 = vsub.s32 %v388_v4, %v375_v0 }
  0xdf   :  { %478 = vtanh.f32 %v124_v8 }
  0xe0   :  { %480 = vtanh.f32 %v127_v11 }
  0xe1   :  { %482 = vtanh.f32 %v128_v12 }
  0xe8   :  { %v477_v9 = vpop.eup %476 }
  0xe9   :  { %139 = vrot.lane.b32.xlu0 %v477_v9, %s512_s1  ;;  %v479_v10 = vpop.eup %478 }
  0xea   :  { %v481_v13 = vpop.eup %480 }
  0xeb   :  { %v131_v14 = vadd.f32 1.0, %v481_v13  ;;  %v483_v15 = vpop.eup %482 }
  0xec   :  { %v132_v17 = vadd.f32 1.0, %v483_v15 }
  0xed   :  { %141 = vrot.lane.b32.xlu0 %v479_v10, %s512_s1  ;;  %v133_v16 = vmul.f32 0.5, %v131_v14 }
  0xee   :  { %v134_v20 = vmul.f32 0.5, %v132_v17 }
 0x15b   :  { %v140_v18 = vpop.permute.xlu0 %139 }
 0x15c   :  { %v145_v19 = vmul.f32 %v140_v18, %v133_v16 }
 0x15e   :  { %484 = vtanh.f32 %v145_v19 }
 0x15f   :  { %v142_v21 = vpop.permute.xlu0 %141 }
 0x160   :  { %v146_v22 = vmul.f32 %v142_v21, %v134_v20 }
 0x162   :  { %486 = vtanh.f32 %v146_v22 }
 0x168   :  { %v485_v26 = vpop.eup %484 }
 0x169   :  { %151 = vrot.lane.b32.xlu1 %v485_v26, %s513_s20 }
 0x16c   :  { %v487_v27 = vpop.eup %486 }
 0x16d   :  { %153 = vrot.lane.b32.xlu1 %v487_v27, %s513_s20 }
 0x1db   :  { %v152_v31 = vpop.permute.xlu1 %151 }
 0x1dc   :  { %v157_v32 = vmul.f32 %v152_v31, %v133_v16 }
 0x1de   :  { %v159_v33 = vmax.f32 %v157_v32, 0.0 }
 0x1df   :  { %v154_v34 = vpop.permute.xlu1 %153 }
 0x1e0   :  { %v158_v35 = vmul.f32 %v154_v34, %v134_v20  ;;  %174 = vrot.lane.b32.xlu0 %v159_v33, %s514_s25 }
 0x1e2   :  { %v160_v36 = vmax.f32 %v158_v35, 0.0 }
 0x1e4   :  { %176 = vrot.lane.b32.xlu1 %v160_v36, %s514_s25 }
 0x252   :  { %v175_v37 = vpop.permute.xlu0 %174 }
 0x253   :  { %448 = vmatprep.mubr.msk.f32.mxu1 %vm178_vm1, %v175_v37 }
 0x256   :  { %v177_v38 = vpop.permute.xlu1 %176 }
 0x257   :  { %449 = vmatmul.mubr.msk.f32.vlgmr.msra.gmra.mrb[0].mxu1 %vm178_vm1, %v177_v38 }
 0x32a   :  { %v450_v43 = vpop.f32.mrb[0].mxu1 }
 0x32b   :  { %v255_v44 = vadd.f32 %v450_v43, %v415_v42  ;;  %v249_v45 = vpop.f32.mrb[1].mxu1 }
 0x32c   :  { %v250_v46 = vadd.f32 %v415_v42, %v249_v45 }
 0x32d   :  { %v259_v48 = vmax.f32 %v255_v44, 0.0 }
 0x32e   :  { %v258_v47 = vmax.f32 %v250_v46, 0.0 }
 0x330   :  { %455 = vmatprep.mubr.msk.f32.mxu0 %vm269_vm2, %v258_v47 }
 0x331   :  { %456 = vmatmul.mubr.msk.f32.vlgmr.msra.gmra.mrb[2].mxu0 %vm269_vm2, %v259_v48 }
 0x404   :  { %v457_v51 = vpop.f32.mrb[2].mxu0 }
 0x405   :  { %v348_v52 = vadd.f32 %v457_v51, %v418_v50  ;;  %v342_v53 = vpop.f32.mrb[3].mxu0 }
 0x406   :  { %v343_v54 = vadd.f32 %v418_v50, %v342_v53 }
 0x407   :  { %v352_v56 = vmax.f32 %v348_v52, 0.0 }
 0x408   :  { %v351_v57 = vmax.f32 %v343_v54, 0.0 }
 0x409   :  { %v361_v58 = vmul.f32 %v421_v55, %v352_v56 }
 0x40a   :  { %v360_v59 = vmul.f32 %v421_v55, %v351_v57 }
 0x40b   :  { %v365_v60 = vsel %vm45_vm0, %v361_v58, 0.0 }
 0x40c   :  { %366 = vadd.xlane.f32.xlu1 %v365_v60  ;;  %v362_v61 = vsel %vm45_vm0, %v360_v59, 0.0 }
 0x40d   :  { %363 = vadd.xlane.f32.xlu0 %v362_v61 }
 0x423   :  { %371 = vperm.xlu0 %475, %v368_v62  }
 0x499   :  { %v367_v9 = vpop.xlane.xlu1 %366 }
 0x49a   :  { %v364_v2 = vpop.xlane.xlu0 %363 }
 0x4a2   :  { %v372_v5 = vpop.permute.xlu0 %371 }
 0x4a3   :  { %v377_v8 = vrot.slane %v372_v5, %v376_v3 }
 0x4a5   :  { %v378_v10 = vadd.f32 %v377_v8, %v364_v2  ;;  %v379_v11 = vadd.f32 %v377_v8, %v367_v9 }
 0x4a7   :  { %v387_v12 = vrot.slane %v378_v10, %v386_v6  ;;  %v392_v13 = vrot.slane %v379_v11, %v391_v7 }
 0x4a9   :  { %v394_v14 = vsel %vm393_vm3, %v392_v13, %v387_v12 }
 0x4aa   :  { %397 = vst.msk [vmem:[#allocation3] sm:$0x1] %vm396_vm4, %v394_v14 }
 0x4ab   :  { %499 = shalt.err (!%p496_p4)
}
 0x4ac   :  { %s500_s16 = scalar_lea.hbm %s634_s9, 16 }
 0x4ad   :  { %p501_p5 = scmp.ne.s32.totalorder %s634_s9, %s500_s16  ;;  %p504_p6 = scmp.lt.u32.totalorder %s500_s16, %s634_s9 }
 0x4af   :  { %p506_p7 = pnand %p504_p6, %p501_p5 }
 0x4b1   :  { %509 = shalt.err (!%p506_p7)
}
 0x4b2   :  { %407 = dma.vmem_to_hbm [thread:$0]  %s405_s7, 16, %s634_s9, [#allocation4]  }
 0x4b3   :  { %510 = dma.done.wait [#allocation4], 16  }
 0x4b4   :  { %511 = vsyncadd [#allocation4], 4294967280 }
 0x4b5   :  { %411 = vsyncpa [#allocation4], 1 }

</bundles_post_ra>
